<compile_context>
chip_gen: v7x
topology: tpu7x:2x2x1
jax: 0.10.0
libtpu: 0.0.40
codegen_flags: <defaults>
</compile_context>

<pallas_src>
import functools

import jax
import jax.numpy as jnp
from jax.experimental import pallas as pl
from jax.experimental.pallas import tpu as pltpu


def _round_up(a, b):
    return (a + b - 1) // b * b


# TODO(synk): the PyTorch module takes hidden/final activations as constructor
# arguments; they are fixed here to ReLU (hidden) and Sigmoid (final).
def _hidden_act(h):
    return jnp.maximum(h, 0.0)          # ReLU


def _final_act(h):
    return jax.nn.sigmoid(h)            # Sigmoid


# --------------------------------- kernels ---------------------------------

def _mlp_tile_kernel(x_ref, *rest, num_layers):
    """Push one (tile_m, d_in) row tile through the whole Linear/act chain.

    rest = (W_0, b_0, ..., W_{L-1}, b_{L-1}, out_ref)
    W_l ref: (d_in_l, d_out_l)   b_l ref: (1, d_out_l)   out_ref: (tile_m, d_out_pad)
    """
    out_ref = rest[-1]
    params = rest[:-1]
    h = x_ref[...].astype(jnp.float32)                       # (tile_m, d_in)
    for l in range(num_layers):                              # static unroll
        w = params[2 * l][...].astype(jnp.float32)
        b = params[2 * l + 1][...].astype(jnp.float32)
        h = jnp.dot(h, w, preferred_element_type=jnp.float32) + b
        h = _hidden_act(h) if l < num_layers - 1 else _final_act(h)
    out_ref[...] = h.astype(out_ref.dtype)


def _branch_mlp_kernel(tile_branch_ref, x_ref, *rest, num_layers):
    """Conditional variant: tile_branch_ref is only consumed by index_maps."""
    del tile_branch_ref
    _mlp_tile_kernel(x_ref, *rest, num_layers=num_layers)


# --------------------------------- wrapper ---------------------------------

def task_block_forward(x, command, weights, biases, *, conditional=True,
                       tile_m=None):
    """Pallas equivalent of TaskBlock.forward.

    x:        (B, input_dim) float
    command:  (B,) int, 1-indexed branch id (ignored / may be None when
              conditional=False)
    weights:  list of arrays (num_branches, d_in_l, d_out_l)
    biases:   list of arrays (num_branches, 1, d_out_l)
    returns:  (B, output_dim)
    """
    B, d_in = x.shape
    num_layers = len(weights)
    num_branches = weights[0].shape[0]
    d_out = weights[-1].shape[-1]
    out_dtype = x.dtype

    # Lane-dense output: pad final layer to a multiple of 128 lanes; padded
    # lanes produce sigmoid(0)=0.5 and are sliced away below.
    d_out_pad = _round_up(d_out, 128)
    lane_pad = d_out_pad - d_out
    weights = list(weights)
    biases = list(biases)
    if lane_pad:
        weights[-1] = jnp.pad(weights[-1], ((0, 0), (0, 0), (0, lane_pad)))
        biases[-1] = jnp.pad(biases[-1], ((0, 0), (0, 0), (0, lane_pad)))

    compiler_params = pltpu.CompilerParams(
        dimension_semantics=("parallel",),      # megacore sharding on v7x
        vmem_limit_bytes=32 * 1024 * 1024,      # conservative; fits v7x 64 MiB
    )

    # ---------------- unconditional / single-branch fast path ----------------
    if (not conditional) or num_branches == 1:
        if tile_m is None:
            tile_m = min(256, _round_up(B, 8))
        b_pad = _round_up(B, tile_m)
        xp = jnp.pad(x, ((0, b_pad - B), (0, 0)))

        in_specs = [pl.BlockSpec((tile_m, d_in), lambda t: (t, 0))]
        operands = [xp]
        for w, b in zip(weights, biases):
            w2, b2 = w[0], b[0]                  # single branch, 2-D params
            # Full-extent blocks + constant index -> grid-resident weights.
            in_specs.append(pl.BlockSpec(w2.shape, lambda t: (0, 0)))
            in_specs.append(pl.BlockSpec(b2.shape, lambda t: (0, 0)))
            operands += [w2, b2]

        kernel = functools.partial(_mlp_tile_kernel, num_layers=num_layers)
        out = pl.pallas_call(
            kernel,
            out_shape=jax.ShapeDtypeStruct((b_pad, d_out_pad), out_dtype),
            grid_spec=pltpu.PrefetchScalarGridSpec(
                num_scalar_prefetch=0,
                grid=(b_pad // tile_m,),
                in_specs=in_specs,
                out_specs=pl.BlockSpec((tile_m, d_out_pad), lambda t: (t, 0)),
            ),
            compiler_params=compiler_params,
        )(*operands)
        return out[:B, :d_out]

    # ---------------- conditional path: group rows by command ----------------
    if tile_m is None:
        tile_m = min(256, max(8, _round_up(-(-B // num_branches), 8)))

    cmd0 = jnp.clip(command.astype(jnp.int32) - 1, 0, num_branches - 1)

    counts = jnp.zeros((num_branches,), jnp.int32).at[cmd0].add(1)
    padded_counts = ((counts + tile_m - 1) // tile_m) * tile_m
    group_start = jnp.concatenate(
        [jnp.zeros((1,), jnp.int32), jnp.cumsum(padded_counts)[:-1]])
    counts_excl = jnp.concatenate(
        [jnp.zeros((1,), jnp.int32), jnp.cumsum(counts)[:-1]])

    sort_idx = jnp.argsort(cmd0)
    cmd_sorted = cmd0[sort_idx]
    rank_sorted = jnp.arange(B, dtype=jnp.int32) - counts_excl[cmd_sorted]
    slot_sorted = group_start[cmd_sorted] + rank_sorted
    slot = jnp.zeros((B,), jnp.int32).at[sort_idx].set(slot_sorted)

    # Static capacity: every group padded to a multiple of tile_m.
    n_slots = _round_up(B + num_branches * (tile_m - 1), tile_m)
    num_tiles = n_slots // tile_m
    x_disp = jnp.zeros((n_slots, d_in), x.dtype).at[slot].set(x)

    # Branch id per row tile (all rows in a tile share one branch by
    # construction; unused trailing tiles get a clamped id -> harmless).
    ends = jnp.cumsum(padded_counts)
    tile_start = jnp.arange(num_tiles, dtype=jnp.int32) * tile_m
    tile_branch = jnp.minimum(
        jnp.searchsorted(ends, tile_start, side="right"),
        num_branches - 1).astype(jnp.int32)

    def row_map(t, tb_ref):                 # activations / output: by tile
        del tb_ref
        return (t, 0)

    def branch_map(t, tb_ref):              # params: this tile's branch
        return (tb_ref[t], 0, 0)

    in_specs = [pl.BlockSpec((tile_m, d_in), row_map)]
    operands = [x_disp]
    for w, b in zip(weights, biases):
        nb, dil, dol = w.shape
        assert b.shape == (nb, 1, dol)
        # Leading branch dim squeezed -> kernel refs are 2-D.
        in_specs.append(pl.BlockSpec((None, dil, dol), branch_map))
        in_specs.append(pl.BlockSpec((None, 1, dol), branch_map))
        operands += [w, b]

    kernel = functools.partial(_branch_mlp_kernel, num_layers=num_layers)
    out = pl.pallas_call(
        kernel,
        out_shape=jax.ShapeDtypeStruct((n_slots, d_out_pad), out_dtype),
        grid_spec=pltpu.PrefetchScalarGridSpec(
            num_scalar_prefetch=1,          # tile_branch -> SMEM for index_maps
            grid=(num_tiles,),
            in_specs=in_specs,
            out_specs=pl.BlockSpec((tile_m, d_out_pad), row_map),
        ),
        compiler_params=compiler_params,
    )(tile_branch, *operands)

    # Un-dispatch ("stack") outside the kernel: gather each row's slot.
    return out[slot][:, :d_out]


# ----------------------- reference + parameter init -----------------------

def init_params(key, num_branches, input_dim, hidden_dims, output_dim,
                dtype=jnp.float32):
    dims = [input_dim] + list(hidden_dims) + [output_dim]
    weights, biases = [], []
    for l in range(len(dims) - 1):
        key, kw, kb = jax.random.split(key, 3)
        scale = 1.0 / (dims[l] ** 0.5)
        weights.append(
            jax.random.normal(kw, (num_branches, dims[l], dims[l + 1]), dtype)
            * scale)
        biases.append(
            jax.random.normal(kb, (num_branches, 1, dims[l + 1]), dtype) * 0.1)
    return weights, biases


def task_block_ref(x, command, weights, biases, conditional=True):
    """Pure-JAX reference mirroring the PyTorch Branch/Encoder/Stack code."""
    num_layers = len(weights)
    nb = weights[0].shape[0]
    outs = []
    for i in range(x.shape[0]):
        b = int(command[i]) - 1 if conditional else 0
        b = min(max(b, 0), nb - 1)
        h = x[i][None, :].astype(jnp.float32)
        for l in range(num_layers):
            h = h @ weights[l][b] + biases[l][b]
            h = jnp.maximum(h, 0.0) if l < num_layers - 1 else jax.nn.sigmoid(h)
        outs.append(h[0])
    return jnp.stack(outs, axis=0)          # Stack(dim=0)


if __name__ == "__main__":
    key = jax.random.PRNGKey(0)
    k_x, k_c, k_p1, k_p2 = jax.random.split(key, 4)

    B = 8
    input_dim, hidden_dims, output_dim = 32, (64, 64), 16
    num_branches = 4

    x = jax.random.normal(k_x, (B, input_dim), dtype=jnp.float32)
    command = jax.random.randint(k_c, (B,), 1, num_branches + 1,
                                 dtype=jnp.int32)

    # ---- conditional TaskBlock (Branch of per-command Encoders) ----
    w_c, b_c = init_params(k_p1, num_branches, input_dim, hidden_dims,
                           output_dim)
    out_c = jax.block_until_ready(
        task_block_forward(x, command, w_c, b_c, conditional=True))
    ref_c = task_block_ref(x, command, w_c, b_c, conditional=True)
    assert out_c.shape == (B, output_dim)
    assert jnp.allclose(out_c, ref_c, atol=1e-3, rtol=1e-3), \
        float(jnp.max(jnp.abs(out_c - ref_c)))

    # ---- unconditional TaskBlock (plain Encoder) ----
    w_u, b_u = init_params(k_p2, 1, input_dim, hidden_dims, output_dim)
    out_u = jax.block_until_ready(
        task_block_forward(x, None, w_u, b_u, conditional=False))
    ref_u = task_block_ref(x, jnp.ones((B,), jnp.int32), w_u, b_u,
                           conditional=False)
    assert jnp.allclose(out_u, ref_u, atol=1e-3, rtol=1e-3), \
        float(jnp.max(jnp.abs(out_u - ref_u)))

    print("KERNEL_OK")
</pallas_src>

<mosaic_0001>
module attributes {stable_mosaic.version = 11 : i64} {
  func.func @_branch_mlp_kernel(%arg0: i32, %arg1: memref<5xi32, #tpu.memory_space<smem>>, %arg2: memref<8x32xf32, #tpu.memory_space<vmem>>, %arg3: memref<1x32x64xf32, #tpu.memory_space<vmem>>, %arg4: memref<1x1x64xf32, #tpu.memory_space<vmem>>, %arg5: memref<1x64x64xf32, #tpu.memory_space<vmem>>, %arg6: memref<1x1x64xf32, #tpu.memory_space<vmem>>, %arg7: memref<1x64x128xf32, #tpu.memory_space<vmem>>, %arg8: memref<1x1x128xf32, #tpu.memory_space<vmem>>, %arg9: memref<8x128xf32, #tpu.memory_space<vmem>>) attributes {dimension_semantics = [#tpu.dimension_semantics<parallel>], iteration_bounds = array<i64: 5>, scalar_prefetch = 1 : i64, scratch_operands = 0 : i64, tpu.core_type = #tpu.core_type<tc>, window_params = [{transform_indices = @transform_0, window_bounds = array<i64: 8, 32>}, {transform_indices = @transform_1, window_bounds = array<i64: 1, 32, 64>}, {transform_indices = @transform_2, window_bounds = array<i64: 1, 1, 64>}, {transform_indices = @transform_3, window_bounds = array<i64: 1, 64, 64>}, {transform_indices = @transform_4, window_bounds = array<i64: 1, 1, 64>}, {transform_indices = @transform_5, window_bounds = array<i64: 1, 64, 128>}, {transform_indices = @transform_6, window_bounds = array<i64: 1, 1, 128>}, {transform_indices = @transform_7, window_bounds = array<i64: 8, 128>}]} {
    %c0 = arith.constant 0 : index
    %c0_0 = arith.constant 0 : index
    %0 = vector.load %arg2[%c0, %c0_0] : memref<8x32xf32, #tpu.memory_space<vmem>>, vector<8x32xf32>
    %c0_1 = arith.constant 0 : index
    %c0_2 = arith.constant 0 : index
    %c0_3 = arith.constant 0 : index
    %1 = vector.load %arg3[%c0_1, %c0_2, %c0_3] : memref<1x32x64xf32, #tpu.memory_space<vmem>>, vector<1x32x64xf32>
    %2 = vector.shape_cast %1 : vector<1x32x64xf32> to vector<32x64xf32>
    %c0_4 = arith.constant 0 : index
    %c0_5 = arith.constant 0 : index
    %c0_6 = arith.constant 0 : index
    %3 = vector.load %arg4[%c0_4, %c0_5, %c0_6] : memref<1x1x64xf32, #tpu.memory_space<vmem>>, vector<1x1x64xf32>
    %4 = vector.shape_cast %3 : vector<1x1x64xf32> to vector<1x64xf32>
    %cst = arith.constant dense<0.000000e+00> : vector<8x64xf32>
    %5 = tpu.matmul %0, %2, %cst {dimension_numbers = #tpu.dot_dimension_numbers<[1], [0], [0], [1], [0, 0, 1, 1], [], []>} : vector<8x32xf32>, vector<32x64xf32>, vector<8x64xf32> -> vector<8x64xf32>
    %6 = vector.broadcast %4 : vector<1x64xf32> to vector<8x64xf32>
    %7 = arith.addf %5, %6 : vector<8x64xf32>
    %cst_7 = arith.constant 0.000000e+00 : f32
    %8 = vector.broadcast %cst_7 : f32 to vector<8x64xf32>
    %9 = arith.maximumf %7, %8 : vector<8x64xf32>
    %c0_8 = arith.constant 0 : index
    %c0_9 = arith.constant 0 : index
    %c0_10 = arith.constant 0 : index
    %10 = vector.load %arg5[%c0_8, %c0_9, %c0_10] : memref<1x64x64xf32, #tpu.memory_space<vmem>>, vector<1x64x64xf32>
    %11 = vector.shape_cast %10 : vector<1x64x64xf32> to vector<64x64xf32>
    %c0_11 = arith.constant 0 : index
    %c0_12 = arith.constant 0 : index
    %c0_13 = arith.constant 0 : index
    %12 = vector.load %arg6[%c0_11, %c0_12, %c0_13] : memref<1x1x64xf32, #tpu.memory_space<vmem>>, vector<1x1x64xf32>
    %13 = vector.shape_cast %12 : vector<1x1x64xf32> to vector<1x64xf32>
    %cst_14 = arith.constant dense<0.000000e+00> : vector<8x64xf32>
    %14 = tpu.matmul %9, %11, %cst_14 {dimension_numbers = #tpu.dot_dimension_numbers<[1], [0], [0], [1], [0, 0, 1, 1], [], []>} : vector<8x64xf32>, vector<64x64xf32>, vector<8x64xf32> -> vector<8x64xf32>
    %15 = vector.broadcast %13 : vector<1x64xf32> to vector<8x64xf32>
    %16 = arith.addf %14, %15 : vector<8x64xf32>
    %cst_15 = arith.constant 0.000000e+00 : f32
    %17 = vector.broadcast %cst_15 : f32 to vector<8x64xf32>
    %18 = arith.maximumf %16, %17 : vector<8x64xf32>
    %c0_16 = arith.constant 0 : index
    %c0_17 = arith.constant 0 : index
    %c0_18 = arith.constant 0 : index
    %19 = vector.load %arg7[%c0_16, %c0_17, %c0_18] : memref<1x64x128xf32, #tpu.memory_space<vmem>>, vector<1x64x128xf32>
    %20 = vector.shape_cast %19 : vector<1x64x128xf32> to vector<64x128xf32>
    %c0_19 = arith.constant 0 : index
    %c0_20 = arith.constant 0 : index
    %c0_21 = arith.constant 0 : index
    %21 = vector.load %arg8[%c0_19, %c0_20, %c0_21] : memref<1x1x128xf32, #tpu.memory_space<vmem>>, vector<1x1x128xf32>
    %22 = vector.shape_cast %21 : vector<1x1x128xf32> to vector<1x128xf32>
    %cst_22 = arith.constant dense<0.000000e+00> : vector<8x128xf32>
    %23 = tpu.matmul %18, %20, %cst_22 {dimension_numbers = #tpu.dot_dimension_numbers<[1], [0], [0], [1], [0, 0, 1, 1], [], []>} : vector<8x64xf32>, vector<64x128xf32>, vector<8x128xf32> -> vector<8x128xf32>
    %24 = vector.broadcast %22 : vector<1x128xf32> to vector<8x128xf32>
    %25 = arith.addf %23, %24 : vector<8x128xf32>
    %26 = arith.negf %25 : vector<8x128xf32>
    %27 = math.exp %26 : vector<8x128xf32>
    %cst_23 = arith.constant 1.000000e+00 : f32
    %28 = vector.broadcast %cst_23 : f32 to vector<8x128xf32>
    %29 = arith.addf %28, %27 : vector<8x128xf32>
    %30 = arith.divf %28, %29 : vector<8x128xf32>
    %c0_24 = arith.constant 0 : index
    %c0_25 = arith.constant 0 : index
    %31 = vector.load %arg9[%c0_24, %c0_25] : memref<8x128xf32, #tpu.memory_space<vmem>>, vector<8x128xf32>
    tpu.vector_store %arg9[%c0_24, %c0_25], %30 {strides = array<i32>} : memref<8x128xf32, #tpu.memory_space<vmem>>, vector<8x128xf32>,
    return
  }
  func.func @transform_0(%arg0: i32, %arg1: memref<5xi32, #tpu.memory_space<smem>>) -> (i32, i32) {
    %c0_i32 = arith.constant 0 : i32
    %c0_i32_0 = arith.constant 0 : i32
    return %arg0, %c0_i32 : i32, i32
  }
  func.func @transform_1(%arg0: i32, %arg1: memref<5xi32, #tpu.memory_space<smem>>) -> (i32, i32, i32) {
    %0 = arith.index_cast %arg0 : i32 to index
    %1 = memref.load %arg1[%0] : memref<5xi32, #tpu.memory_space<smem>>
    %c0_i32 = arith.constant 0 : i32
    %c0_i32_0 = arith.constant 0 : i32
    %c0_i32_1 = arith.constant 0 : i32
    return %1, %c0_i32, %c0_i32_0 : i32, i32, i32
  }
  func.func @transform_2(%arg0: i32, %arg1: memref<5xi32, #tpu.memory_space<smem>>) -> (i32, i32, i32) {
    %0 = arith.index_cast %arg0 : i32 to index
    %1 = memref.load %arg1[%0] : memref<5xi32, #tpu.memory_space<smem>>
    %c0_i32 = arith.constant 0 : i32
    %c0_i32_0 = arith.constant 0 : i32
    %c0_i32_1 = arith.constant 0 : i32
    return %1, %c0_i32, %c0_i32_0 : i32, i32, i32
  }
  func.func @transform_3(%arg0: i32, %arg1: memref<5xi32, #tpu.memory_space<smem>>) -> (i32, i32, i32) {
    %0 = arith.index_cast %arg0 : i32 to index
    %1 = memref.load %arg1[%0] : memref<5xi32, #tpu.memory_space<smem>>
    %c0_i32 = arith.constant 0 : i32
    %c0_i32_0 = arith.constant 0 : i32
    %c0_i32_1 = arith.constant 0 : i32
    return %1, %c0_i32, %c0_i32_0 : i32, i32, i32
  }
  func.func @transform_4(%arg0: i32, %arg1: memref<5xi32, #tpu.memory_space<smem>>) -> (i32, i32, i32) {
    %0 = arith.index_cast %arg0 : i32 to index
    %1 = memref.load %arg1[%0] : memref<5xi32, #tpu.memory_space<smem>>
    %c0_i32 = arith.constant 0 : i32
    %c0_i32_0 = arith.constant 0 : i32
    %c0_i32_1 = arith.constant 0 : i32
    return %1, %c0_i32, %c0_i32_0 : i32, i32, i32
  }
  func.func @transform_5(%arg0: i32, %arg1: memref<5xi32, #tpu.memory_space<smem>>) -> (i32, i32, i32) {
    %0 = arith.index_cast %arg0 : i32 to index
    %1 = memref.load %arg1[%0] : memref<5xi32, #tpu.memory_space<smem>>
    %c0_i32 = arith.constant 0 : i32
    %c0_i32_0 = arith.constant 0 : i32
    %c0_i32_1 = arith.constant 0 : i32
    return %1, %c0_i32, %c0_i32_0 : i32, i32, i32
  }
  func.func @transform_6(%arg0: i32, %arg1: memref<5xi32, #tpu.memory_space<smem>>) -> (i32, i32, i32) {
    %0 = arith.index_cast %arg0 : i32 to index
    %1 = memref.load %arg1[%0] : memref<5xi32, #tpu.memory_space<smem>>
    %c0_i32 = arith.constant 0 : i32
    %c0_i32_0 = arith.constant 0 : i32
    %c0_i32_1 = arith.constant 0 : i32
    return %1, %c0_i32, %c0_i32_0 : i32, i32, i32
  }
  func.func @transform_7(%arg0: i32, %arg1: memref<5xi32, #tpu.memory_space<smem>>) -> (i32, i32) {
    %c0_i32 = arith.constant 0 : i32
    %c0_i32_0 = arith.constant 0 : i32
    return %arg0, %c0_i32 : i32, i32
  }
}

</mosaic_0001>

<bundles_post_ra>
// kernel: tpu_custom_call.1
= control target key start
LH: loop header
LB: loop body
LE: loop exit
PB: predicated region body
PF: predicated region fallthrough
CT: control target
= control target key end

     0   :  { %s1971_s0 = inlined_call_operand.vmem [shape: s32[5], index: 0, kind: input, shape index: {}]   ;;  %s1972_s1 = inlined_call_operand.vmem [shape: f32[40,32], index: 1, kind: input, shape index: {}]   ;;  %s1973_s2 = inlined_call_operand.hbm [shape: f32[4,32,64], index: 2, kind: input, shape index: {}]   ;;  %s1974_s3 = inlined_call_operand.vmem [shape: f32[4,1,64], index: 3, kind: input, shape index: {}]   ;;  %s1975_s4 = inlined_call_operand.hbm [shape: f32[4,64,64], index: 4, kind: input, shape index: {}]   ;;  %s1976_s5 = inlined_call_operand.vmem [shape: f32[4,1,64], index: 5, kind: input, shape index: {}]   ;;  %s1977_s6 = inlined_call_operand.hbm [shape: f32[4,64,128], index: 6, kind: input, shape index: {}]   ;;  %s1978_s7 = inlined_call_operand.vmem [shape: f32[4,1,128], index: 7, kind: input, shape index: {}]   ;;  %s1979_s8 = inlined_call_operand.hbm [shape: f32[40,128], index: 8, kind: output, shape index: {}]  }
   0x1   :  { %2000 = sst [smem:[#allocation32_spill]] %s1973_s2  ;;  %s13_s29 = sshll.u32 %s1971_s0, 4  ;;  %s14_s29 = int_to_ptr.vmem [resolvable:$true] %s13_s29 }
   0x2   :  { %2001 = sst [smem:[#allocation33_spill]] %s1975_s4  ;;  %s1195_s30 = scalar_lea.vmem %s14_s29, 16 }
   0x3   :  { %2002 = sst [smem:[#allocation34_spill]] %s1976_s5  ;;  %p1196_p0 = scmp.ne.s32.totalorder %s14_s29, %s1195_s30 }
   0x4   :  { %2003 = sst [smem:[#allocation35_spill]] %s1978_s7  ;;  %p1200_p1 = scmp.lt.s32.totalorder %s14_s29, %s14_s29 }
   0x5   :  { %2004 = sst [smem:[#allocation36_spill]] %s1979_s8  ;;  %p1201_p2 = scmp.lt.s32.totalorder %s1195_s30, %s1195_s30 }
   0x7   :  { %p1202_p3 = por %p1201_p2, %p1200_p1 }
   0x9   :  { %p1203_p4 = pnand %p1202_p3, %p1196_p0 }
   0xb   :  { %1206 = shalt.err (!%p1203_p4)  }
   0xc   :  { %s1447_s9 = smov [#allocation3]  }
   0xd   :  { %16 = dma.vmem_to_smem %s14_s29, 16, %s1447_s9, [#allocation2] }
   0xe   :  { %1377 = dma.done.wait [#allocation2], 16 }
   0xf   :  { %1378 = vsyncadd [#allocation2], 4294967280 }
  0x10   :  { %18 = sfence }
  0x11   :  { %19 = vsyncpa [#allocation5], 0 }
  0x12   :  { %21 = vsyncpa [#allocation5 + $0x1], 0 }
  0x13   :  { %22 = vsyncpa [#allocation8], 0 }
  0x14   :  { %24 = vsyncpa [#allocation8 + $0x1], 0 }
  0x15   :  { %25 = vsyncpa [#allocation6], 0 }
  0x16   :  { %27 = vsyncpa [#allocation6 + $0x1], 0  ;;  %s1505_s0 = smov 0   ;;  %s1507_s10 = smov 0  }
  0x17   :  { %s1509_s11 = smov 0   ;;  %s1511_s12 = smov 0  }
  0x18   :  { %s1513_s13 = smov 0   ;;  %s1515_s14 = smov 0  }
  0x19   :  { %s1517_s15 = smov 0   ;;  %s1519_s16 = smov 0  }
  0x1a   :  { %s1521_s17 = smov 0   ;;  %s1523_s18 = smov 0  }
  0x1b   :  { %s1525_s19 = smov 0   ;;  %s1527_s20 = smov 0  }
  0x1c   :  { %s1529_s21 = smov 0  }
  0x1d LB: > { %2005 = sst [smem:[#allocation22_spill]] %s1397_s0  ;;  %s1569_s22 = sadd.s32 4294967295, %s1445_s21   ;;  %s1445_s21 = sphi %s1529_s21, %s2068_s21   ;;  %s1441_s20 = sphi %s1527_s20, %s2060_s20   ;;  %s1437_s19 = sphi %s1525_s19, %s2067_s19   ;;  %s1433_s18 = sphi %s1523_s18, %s2066_s18   ;;  %s1429_s17 = sphi %s1521_s17, %s2058_s17   ;;  %s1425_s16 = sphi %s1519_s16, %s2065_s16   ;;  %s1421_s15 = sphi %s1517_s15, %s2064_s15   ;;  %s1417_s14 = sphi %s1515_s14, %s2063_s14   ;;  %s1413_s13 = sphi %s1513_s13, %s2062_s13   ;;  %s1409_s12 = sphi %s1511_s12, %s2061_s12   ;;  %s1405_s11 = sphi %s1509_s11, %s2056_s11   ;;  %s1401_s10 = sphi %s1507_s10, %s2055_s10   ;;  %s1397_s0 = sphi %s1505_s0, %s2054_s0  }
  0x1e   : > { %2006 = sst [smem:[#allocation23_spill]] %s1401_s10  ;;  %s911_s23 = sadd.s32 4294967294, %s1445_s21  }
  0x1f   : > { %2007 = sst [smem:[#allocation24_spill]] %s1405_s11  ;;  %s1573_s24 = sadd.s32 1, %s1445_s21  }
  0x20   : > { %2008 = sst [smem:[#allocation25_spill]] %s1429_s17  ;;  %p1989_p5 = scmp.eq.s32.totalorder %s1569_s22, 0 }
  0x21   : > { %2009 = sst [smem:[#allocation26_spill]] %s1441_s20  ;;  %p1990_p6 = scmp.eq.s32.totalorder %s1445_s21, 0 }
  0x22   : > { %s119_s25 = sld [smem:[#allocation3 + %s1445_s21]]  ;;  %s124_s27 = sadd.s32 1, %s1429_s17 }
  0x23   : > { %s120_s26 = sld [smem:[#allocation3 + %s1573_s24]]  ;;  %p137_p7 = scmp.ne.s32.totalorder %s1425_s16, %s1421_s15 }
  0x24   : > { %p131_p8 = scmp.ne.s32.totalorder %s1429_s17, %s1425_s16  ;;  %s231_s28 = ssub.s32 %s1445_s21, %s1573_s24 }
  0x25   : > { %p1587_p9 = por %p137_p7, %p1989_p5  ;;  %s234_s30 = sadd.s32 1, %s1405_s11 }
  0x26   : > { %p232_p10 = scmp.eq.s32.totalorder %s231_s28, 0  ;;  %p244_p11 = scmp.ne.s32.totalorder %s1405_s11, %s1401_s10 }
  0x27   : > { %s2010_s29 = scalar_select %p1587_p9, 1, 0 }
  0x28   : > { %p245_p12 = scmp.eq.s32.totalorder %s1569_s22, 4  ;;  %p250_p13 = scmp.ne.s32.totalorder %s1401_s10, %s1397_s0 }
  0x29   : > { %s121_s9 = ssub.s32 %s119_s25, %s120_s26  ;;  %p251_p0 = scmp.eq.s32.totalorder %s911_s23, 4 }
  0x2a   : > { %p122_p1 = scmp.eq.s32.totalorder %s121_s9, 0  ;;  %p1597_p2 = por %p245_p12, %p244_p11 }
  0x2b   : > { %s1602_s8 = scalar_select %p232_p10, %s1405_s11, %s234_s30  }
  0x2c   : > { %s2011_s15 = scalar_select %p1597_p2, 1, 0 }
  0x2d   : > { %2013 = sst [smem:[#allocation28_spill]] %s1602_s8  ;;  %p1607_p3 = por %p251_p0, %p250_p13 }
  0x2e   : > { %2012 = sst [smem:[#allocation27_spill]] %s2011_s15  ;;  %p133_p4 = por %p131_p8, %p1990_p6 }
  0x2f   : > { %s1605_s7 = scalar_select %p122_p1, %s1429_s17, %s124_s27  }
  0x30   : > { %s2015_s28 = scalar_select %p1607_p3, 1, 0 }
  0x31   : > { %2014 = sst [smem:[#allocation29_spill]] %s1605_s7  ;;  %p1988_p7 = scmp.lt.s32.totalorder %s1445_s21, 5 }
  0x32   : > { %2016 = sst [smem:[#allocation30_spill]] %s2015_s28  ;;  %s308_s23 = sand.u32 1, %s1445_s21  }
  0x33   : > { %s310_s25 = sand.u32 1, %s1429_s17   ;;  %p1621_p11 = pnand %p1988_p7, %p133_p4 }
  0x34   : > { %s917_s26 = sshll.u32 %s310_s25, 6  ;;  %p923_p10 = scmp.ge.s32.totalorder %s1445_s21, 1 }
  0x35   : > { %s1048_s27 = scalar_select %p133_p4, [#allocation3], [#allocation12] }
  0x36   : > { %s1049_s9 = scalar_select %p133_p4, %s1445_s21, 0 }
  0x37   : > { %s2070_s27 = smov (!%p1988_p7, %s1048_s27), [#allocation15]  ;;  %s312_s7 = scalar_lea.vmem [#allocation7], %s917_s26 }
  0x38   : > { %s2072_s9 = smov (!%p1988_p7, %s1049_s9), 0  ;;  %s320_s8 = sshll.u32 %s312_s7, 4  ;;  %s1631_s8 = int_to_ptr.vmem [resolvable:$true] %s320_s8 }
  0x39   : > { %s313_s17 = sld [smem:[%s2070_s27 + %s2072_s9]]  ;;  %p366_p8 = scmp.lt.s32.totalorder %s1445_s21, 6 }
  0x3a   : > { %s1639_s11 = sld [smem:[#allocation3 + %s1445_s21]]  ;;  %s1651_s7 = scalar_lea.sflag [#allocation8], %s308_s23 }
  0x3b   : > { %p1634_p12 = pnand %p923_p10, %p366_p8  ;;  %s1642_s28 = sld [smem:[#allocation3 + %s1573_s24]] }
  0x3c   : > { %s2019_s4 = sld [smem:[#allocation33_spill]]  ;;  %p1209_p1 = pneg %p1621_p11 }
  0x3d   : > { %s2018_s25 = scalar_select %p1634_p12, 1, 0 }
  0x3f   : > { %s941_s0 = sshll.u32 %s313_s17, 10 }
  0x42   : > { %s1647_s5 = scalar_lea.hbm %s2019_s4, %s941_s0  ;;  %s1212_s0 = scalar_lea.hbm %s2019_s4, 4096 }
  0x43   : > { %s1207_s26 = scalar_lea.hbm %s1647_s5, 1024  ;;  %p1213_p8 = scmp.lt.u32.totalorder %s1647_s5, %s2019_s4 }
  0x44   : > { %p1208_p0 = scmp.ne.s32.totalorder %s1647_s5, %s1207_s26  ;;  %p1214_p7 = scmp.lt.u32.totalorder %s1212_s0, %s1207_s26 }
  0x45   : > { %p1216_p6 = scmp.lt.u32.totalorder %s1207_s26, %s1647_s5 }
  0x46   : > { %p1210_p4 = pnand %p1209_p1, %p1208_p0  ;;  %p1215_p5 = por %p1214_p7, %p1213_p8 }
  0x48   : > { %p1211_p10 = pneg %p1210_p4  ;;  %p1217_p13 = por %p1216_p6, %p1215_p5 }
  0x4a   : > { %p1218_p3 = pnand %p1217_p13, %p1211_p10 }
  0x4c   : > { %1221 = shalt.err (!%p1218_p3)
}
  0x4d   : > { %s1222_s23 = scalar_lea.vmem %s1631_s8, 1024  ;;  %s1448_s9 = smov [#allocation7]  }
  0x4e   : > { %p1223_p0 = scmp.ne.s32.totalorder %s1631_s8, %s1222_s23  ;;  %s1227_s17 = sshll.u32 %s1448_s9, 4  ;;  %s1228_s17 = int_to_ptr.vmem [resolvable:$false] %s1227_s17 }
  0x4f   : > { %s1229_s27 = scalar_lea.vmem %s1228_s17, 2048  ;;  %p1230_p9 = scmp.lt.s32.totalorder %s1631_s8, %s1228_s17 }
  0x50   : > { %p1225_p4 = pnand %p1223_p0, %p1209_p1  ;;  %p1231_p7 = scmp.lt.s32.totalorder %s1229_s27, %s1222_s23 }
  0x52   : > { %p1226_p2 = pneg %p1225_p4  ;;  %p1232_p8 = por %p1231_p7, %p1230_p9 }
  0x54   : > { %p1233_p5 = pnand %p1232_p8, %p1226_p2 }
  0x56   : > { %1236 = shalt.err (!%p1233_p5)
}
  0x57   : > { %s1993_s26 = smov 128   ;;  %s1995_s0 = smov 8  }
  0x58   : > { %1069 = dma.hbm_to_vmem [thread:$0]  (!%p1621_p11), %s1647_s5, 1024, %s1631_s8, %s1651_s7, %s1993_s26, %s1993_s26, %s1995_s0  }
  0x59   : > { %s68_s10 = sadd.s32 1, %s1441_s20  ;;  %p81_p6 = scmp.ne.s32.totalorder %s1437_s19, %s1433_s18 }
  0x5a   : > { %p2020_p9 = scmp.ne.s32.totalorder %s1441_s20, %s1437_s19  ;;  %p2021_p2 = scmp.eq.s32.totalorder %s1445_s21, 0 }
  0x5b   : > { %s278_s15 = sand.u32 1, %s1441_s20   ;;  %s65_s23 = ssub.s32 %s1639_s11, %s1642_s28 }
  0x5c   : > { %p77_p3 = por %p2021_p2, %p2020_p9  ;;  %p2022_p13 = scmp.eq.s32.totalorder %s1569_s22, 0 }
  0x5d   : > { %p66_p10 = scmp.eq.s32.totalorder %s65_s23, 0  ;;  %s914_s5 = sshll.u32 %s278_s15, 5 }
  0x5e   : > { %p1695_p1 = por %p2022_p13, %p81_p6  ;;  %p2024_p11 = scmp.lt.s32.totalorder %s1445_s21, 5 }
  0x5f   : > { %s1706_s18 = scalar_select %p66_p10, %s1441_s20, %s68_s10  }
  0x60   : > { %s2023_s9 = scalar_select %p1695_p1, 1, 0 }
  0x61   : > { %p1701_p0 = pnand %p2024_p11, %p77_p3  ;;  %2026 = sst [smem:[#allocation31_spill]] %s1706_s18 }
  0x62   : > { %s1045_s11 = scalar_select %p77_p3, [#allocation3], [#allocation11] }
  0x63   : > { %s1046_s28 = scalar_select %p77_p3, %s1445_s21, 0 }
  0x64   : > { %p2027_p4 = pmov %p2024_p11  ;;  %s282_s17 = scalar_lea.vmem [#allocation4], %s914_s5 }
  0x65   : > { %s290_s27 = sshll.u32 %s282_s17, 4  ;;  %s1714_s23 = sld [smem:[#allocation3 + %s1445_s21]]  ;;  %s1719_s27 = int_to_ptr.vmem [resolvable:$true] %s290_s27 }
  0x66   : > { %s2074_s11 = smov (!%p2027_p4, %s1045_s11), [#allocation14]  ;;  %p2028_p7 = pmov %p2027_p4 }
  0x67   : > { %s1717_s26 = sld [smem:[#allocation3 + %s1573_s24]]  ;;  %p187_p8 = scmp.ne.s32.totalorder %s1417_s14, %s1413_s13 }
  0x68   : > { %s2076_s28 = smov (!%p2028_p7, %s1046_s28), 0  ;;  %p193_p5 = scmp.ne.s32.totalorder %s1413_s13, %s1409_s12 }
  0x69   : > { %s283_s30 = sld [smem:[%s2074_s11 + %s2076_s28]]  ;;  %p2029_p6 = pmov %p2021_p2 }
  0x6a   : > { %s2031_s2 = sld [smem:[#allocation32_spill]]  ;;  %p2032_p2 = pmov %p2022_p13 }
  0x6b   : > { %p1728_p9 = por %p187_p8, %p2029_p6  ;;  %s1743_s12 = scalar_lea.sflag [#allocation5], %s278_s15 }
  0x6c   : > { %p1739_p3 = por %p193_p5, %p2032_p2  ;;  %p1239_p10 = pneg %p1701_p0 }
  0x6e   : > { %s2033_s17 = scalar_select %p1739_p3, 1, 0 }
  0x6f   : > { %s940_s0 = sshll.u32 %s283_s30, 9 }
  0x70   : > { %s1735_s5 = scalar_lea.hbm %s2031_s2, %s940_s0  ;;  %s1242_s28 = scalar_lea.hbm %s2031_s2, 2048 }
  0x71   : > { %s1237_s30 = scalar_lea.hbm %s1735_s5, 512  ;;  %p1243_p7 = scmp.lt.u32.totalorder %s1735_s5, %s2031_s2 }
  0x72   : > { %p1238_p13 = scmp.ne.s32.totalorder %s1735_s5, %s1237_s30  ;;  %p1244_p8 = scmp.lt.u32.totalorder %s1242_s28, %s1237_s30 }
  0x73   : > { %p1246_p6 = scmp.lt.u32.totalorder %s1237_s30, %s1735_s5 }
  0x74   : > { %p1240_p11 = pnand %p1239_p10, %p1238_p13  ;;  %p1245_p5 = por %p1244_p8, %p1243_p7 }
  0x76   : > { %p1241_p4 = pneg %p1240_p11  ;;  %p1247_p2 = por %p1246_p6, %p1245_p5 }
  0x78   : > { %p1248_p3 = pnand %p1247_p2, %p1241_p4 }
  0x7a   : > { %1251 = shalt.err (!%p1248_p3)
}
  0x7b   : > { %s1252_s15 = scalar_lea.vmem %s1719_s27, 512  ;;  %s1451_s0 = smov [#allocation4]  }
  0x7c   : > { %p1253_p13 = scmp.ne.s32.totalorder %s1719_s27, %s1252_s15  ;;  %s1257_s11 = sshll.u32 %s1451_s0, 4  ;;  %s1258_s11 = int_to_ptr.vmem [resolvable:$false] %s1257_s11 }
  0x7d   : > { %s1259_s18 = scalar_lea.vmem %s1258_s11, 1024  ;;  %p1260_p12 = scmp.lt.s32.totalorder %s1719_s27, %s1258_s11 }
  0x7e   : > { %p1255_p11 = pnand %p1253_p13, %p1239_p10  ;;  %p1261_p7 = scmp.lt.s32.totalorder %s1259_s18, %s1252_s15 }
  0x80   : > { %p1256_p1 = pneg %p1255_p11  ;;  %p1262_p8 = por %p1261_p7, %p1260_p12 }
  0x82   : > { %p1263_p5 = pnand %p1262_p8, %p1256_p1 }
  0x84   : > { %1266 = shalt.err (!%p1263_p5)
}
  0x85   : > { %s2034_s10 = smov 8   ;;  %s2035_s30 = smov 128  }
  0x86   : > { %1064 = dma.hbm_to_vmem [thread:$0]  (!%p1701_p0), %s1735_s5, 512, %s1719_s27, %s1743_s12, %s2035_s30, %s2035_s30, %s2034_s10  }
  0x87   : > { %s177_s8 = ssub.s32 %s1714_s23, %s1717_s26  ;;  %s180_s28 = sadd.s32 1, %s1417_s14 }
  0x88   : > { %p178_p12 = scmp.eq.s32.totalorder %s177_s8, 0  ;;  %s2036_s15 = sand.u32 1, %s1417_s14  }
  0x89   : > { %s920_s0 = sshll.u32 %s2036_s15, 6  ;;  %p2037_p1 = scmp.lt.s32.totalorder %s1445_s21, 5 }
  0x8a   : > { %s1051_s11 = scalar_select %p1728_p9, [#allocation3], [#allocation13] }
  0x8b   : > { %s1782_s18 = scalar_select %p178_p12, %s1417_s14, %s180_s28  }
  0x8c   : > { %s1052_s2 = scalar_select %p1728_p9, %s1445_s21, 0 }
  0x8d   : > { %s2078_s11 = smov (!%p2037_p1, %s1051_s11), [#allocation16]  ;;  %p2038_p3 = pmov %p2037_p1 }
  0x8e   : > { %p2039_p10 = pmov %p2037_p1  ;;  %s342_s27 = scalar_lea.vmem [#allocation9], %s920_s0 }
  0x8f   : > { %s2080_s2 = smov (!%p2038_p3, %s1052_s2), 0  ;;  %s350_s23 = sshll.u32 %s342_s27, 4  ;;  %s1799_s23 = int_to_ptr.vmem [resolvable:$true] %s350_s23 }
  0x90   : > { %p1795_p4 = pnand %p2039_p10, %p1728_p9  ;;  %s343_s26 = sld [smem:[%s2078_s11 + %s2080_s2]] }
  0x91   : > { %s1272_s0 = scalar_lea.hbm %s1977_s6, 4096 }
  0x92   : > { %p1269_p9 = pneg %p1795_p4 }
  0x96   : > { %s942_s5 = sshll.u32 %s343_s26, 10 }
  0x97   : > { %s1804_s28 = scalar_lea.hbm %s1977_s6, %s942_s5 }
  0x98   : > { %s1267_s4 = scalar_lea.hbm %s1804_s28, 1024  ;;  %p1273_p13 = scmp.lt.u32.totalorder %s1804_s28, %s1977_s6 }
  0x99   : > { %p1268_p0 = scmp.ne.s32.totalorder %s1804_s28, %s1267_s4  ;;  %p1274_p11 = scmp.lt.u32.totalorder %s1272_s0, %s1267_s4 }
  0x9a   : > { %p1276_p8 = scmp.lt.u32.totalorder %s1267_s4, %s1804_s28 }
  0x9b   : > { %p1270_p6 = pnand %p1269_p9, %p1268_p0  ;;  %p1275_p7 = por %p1274_p11, %p1273_p13 }
  0x9d   : > { %p1271_p2 = pneg %p1270_p6  ;;  %p1277_p5 = por %p1276_p8, %p1275_p7 }
  0x9f   : > { %p1278_p12 = pnand %p1277_p5, %p1271_p2 }
  0xa1   : > { %1281 = shalt.err (!%p1278_p12)
}
  0xa2   : > { %s1282_s27 = scalar_lea.vmem %s1799_s23, 1024  ;;  %s1452_s5 = smov [#allocation9]  }
  0xa3   : > { %p1283_p1 = scmp.ne.s32.totalorder %s1799_s23, %s1282_s27  ;;  %s1287_s12 = sshll.u32 %s1452_s5, 4  ;;  %s1288_s12 = int_to_ptr.vmem [resolvable:$false] %s1287_s12 }
  0xa4   : > { %s1289_s8 = scalar_lea.vmem %s1288_s12, 2048  ;;  %p1290_p0 = scmp.lt.s32.totalorder %s1799_s23, %s1288_s12 }
  0xa5   : > { %p1285_p3 = pnand %p1283_p1, %p1269_p9  ;;  %p1291_p6 = scmp.lt.s32.totalorder %s1289_s8, %s1282_s27 }
  0xa7   : > { %p1286_p10 = pneg %p1285_p3  ;;  %p1292_p13 = por %p1291_p6, %p1290_p0 }
  0xa9   : > { %p1293_p11 = pnand %p1292_p13, %p1286_p10 }
  0xab   : > { %1296 = shalt.err (!%p1293_p11)
}
  0xac   : > { %1074 = dma.hbm_to_vmem [thread:$0]  (!%p1795_p4), %s1804_s28, 1024, %s1799_s23, %s1651_s7, %s2035_s30, %s2035_s30, %s2034_s10  }
  0xad   : > { %p2041_p9 = scmp.ne.s32.totalorder %s2018_s25, 0 }
  0xae   : > { %s372_s4 = sand.u32 (!%p2041_p9), 1, %s1437_s19   ;;  %p2042_p2 = scmp.ne.s32.totalorder (!%p2041_p9), %s2023_s9, 0 }
  0xaf   : > { %370 = sbr.rel (%p2041_p9) target bundleno = 889 (0x379), region = 48  ;;  %s924_s2 = sshll.u32 (!%p2041_p9), %s372_s4, 5 }
  0xb0   : > { %s373_s15 = scalar_lea.sflag (!%p2041_p9), [#allocation5], %s372_s4  ;;  %s376_s0 = scalar_lea.vmem (!%p2041_p9), [#allocation4], %s924_s2 }
  0xb6   : > { %1380 = dma.done.wait (%p2042_p2), %s373_s15, 512  }
  0xb7   : > { %1382 = vsyncadd (%p2042_p2), %s373_s15, 4294966784  ;;  %s381_s20 = sand.u32 1, %s1569_s22   ;;  %s383_s11 = sand.u32 1, %s1425_s16  }
  0xb8   : > { %s925_s7 = sshll.u32 %s383_s11, 6  ;;  %s382_s10 = scalar_lea.sflag [#allocation8], %s381_s20 }
  0xb9   : > { %s1844_s25 = scalar_lea.vmem [#allocation7], %s925_s7  ;;  %p2043_p4 = scmp.ne.s32.totalorder %s2010_s29, 0 }
  0xbb   : > { %1384 = dma.done.wait (%p2043_p4), %s382_s10, 1024  }
  0xbc   : > { %1386 = vsyncadd (%p2043_p4), %s382_s10, 4294966272  ;;  %s392_s30 = sand.u32 1, %s1413_s13   ;;  %p2044_p7 = scmp.ne.s32.totalorder %s2033_s17, 0 }
  0xbd   : > { %s926_s23 = sshll.u32 %s392_s30, 6 }
  0xbe   : > { %s1851_s9 = scalar_lea.vmem [#allocation9], %s926_s23 }
  0xbf   : > { %1388 = dma.done.wait (%p2044_p7), %s382_s10, 1024  }
  0xc0   : > { %1390 = vsyncadd (%p2044_p7), %s382_s10, 4294966272  ;;  %p451_p8 = scmp.lt.s32.totalorder %s1569_s22, 4  ;;  %v1453_v0 = vmov 0.0|0.0   ;;  %vm1454_vm0 = vmmov 0   ;;  %v1455_v1 = vmov 0.0   ;;  %v474_v2 = vld [vmem:[%s376_s0] sm:$0xff] }
  0xc1   : > { %1015 = vmatprep.subr.bf16.mxu0 %v1453_v0  ;;  %974 = vmatprep.mubr.msk.f32.mxu0 %vm1454_vm0, %v1455_v1  ;;  %v475_v3 = vld [vmem:[%s376_s0 + $0x8] sm:$0xff]  ;;  %v476_v4 = vld [vmem:[%s376_s0 + $0x10] sm:$0xff]  ;;  %v477_v6 = vld [vmem:[%s376_s0 + $0x18] sm:$0xff]  ;;  %vm485_vm1 = vcmask 261120   ;;  %s456_s5 = sld [smem:[#allocation3 + %s1569_s22]]  ;;  %vm575_vm2 = vcmask 523264  }
  0xc2   : > { %1021 = vmatprep.subr.bf16.mxu1 %v1453_v0  ;;  %993 = vmatprep.mubr.msk.f32.mxu1 %vm1454_vm0, %v1455_v1  ;;  %s452_s29 = scalar_select %p451_p8, %s1569_s22, 4  ;;  %v1016_v5 = vpack.c.bf16 %v475_v3, %v474_v2  ;;  %v560_v7 = vld [vmem:[%s1844_s25] sm:$0xff]  ;;  %v561_v8 = vld [vmem:[%s1844_s25 + $0x8] sm:$0xff]  ;;  %v562_v9 = vld [vmem:[%s1844_s25 + $0x10] sm:$0xff]  ;;  %v1019_v11 = vpack.c.bf16 %v477_v6, %v476_v4 }
  0xc3   : > { %v563_v10 = vld [vmem:[%s1844_s25 + $0x18] sm:$0xff]  ;;  %v1022_v12 = vpack.c.bf16 %v561_v8, %v560_v7  ;;  %v564_v14 = vld [vmem:[%s1844_s25 + $0x20] sm:$0xff]  ;;  %v565_v15 = vld [vmem:[%s1844_s25 + $0x28] sm:$0xff]  ;;  %s462_s2 = sld [smem:[#allocation3 + %s1569_s22]]  ;;  %s937_s26 = sshll.u32 %s1569_s22, 7 }
  0xc4   : > { %s928_s17 = sshll.u32 %s452_s29, 3  ;;  %1017 = vmatpush3.bf16.msra.mxu0 %v1016_v5  ;;  %v1025_v13 = vpack.c.bf16 %v563_v10, %v562_v9  ;;  %v1028_v17 = vpack.c.bf16 %v565_v15, %v564_v14  ;;  %v566_v18 = vld [vmem:[%s1844_s25 + $0x30] sm:$0xff]  ;;  %v567_v19 = vld [vmem:[%s1844_s25 + $0x38] sm:$0xff]  ;;  %v650_v21 = vld [vmem:[%s1851_s9] sm:$0xff]  ;;  %s2045_s20 = sld [smem:[#allocation34_spill]] }
  0xc5   : > { %1018 = vmatprep.subr.bf16.mxu0 %v1453_v0  ;;  %s454_s27 = scalar_lea.vmem %s1972_s1, %s928_s17  ;;  %1023 = vmatpush3.bf16.msra.mxu1 %v1022_v12  ;;  %v1031_v20 = vpack.c.bf16 %v567_v19, %v566_v18  ;;  %v651_v22 = vld [vmem:[%s1851_s9 + $0x8] sm:$0xff]  ;;  %v652_v23 = vld [vmem:[%s1851_s9 + $0x10] sm:$0xff]  ;;  %v653_v25 = vld [vmem:[%s1851_s9 + $0x18] sm:$0xff]  ;;  %s2046_s7 = sld [smem:[#allocation23_spill]] }
  0xc6   : > { %1024 = vmatprep.subr.bf16.mxu1 %v1453_v0  ;;  %v473_v16 = vld [vmem:[%s454_s27] sm:$0xff]  ;;  %v1034_v24 = vpack.c.bf16 %v651_v22, %v650_v21  ;;  %v1037_v26 = vpack.c.bf16 %v653_v25, %v652_v23  ;;  %v655_v28 = vld [vmem:[%s1851_s9 + $0x28] sm:$0xff]  ;;  %v656_v35 = vld [vmem:[%s1851_s9 + $0x30] sm:$0xff]  ;;  %s468_s10 = sld [smem:[#allocation3 + %s1569_s22]]  ;;  %s1456_s22 = smov [#allocation10]  }
  0xc7   : > { %v654_v27 = vld [vmem:[%s1851_s9 + $0x20] sm:$0xff]  ;;  %p457_p5 = scmp.lt.s32.totalorder %s456_s5, 3  ;;  %v657_v36 = vld [vmem:[%s1851_s9 + $0x38] sm:$0xff]  ;;  %s2047_s23 = sld [smem:[#allocation35_spill]] }
  0xc8   : > { %1020 = vmatpush3.bf16.msra.mxu0 %v1019_v11  ;;  %v1040_v29 = vpack.c.bf16 %v655_v28, %v654_v27  ;;  %v1043_v37 = vpack.c.bf16 %v657_v36, %v656_v35  ;;  %s2048_s29 = sld [smem:[#allocation27_spill]] }
  0xc9   : > { %1033 = vmatprep.subr.bf16.mxu0 %v1453_v0  ;;  %1026 = vmatpush3.bf16.msra.mxu1 %v1025_v13  ;;  %s2082_s5 = smov (!%p457_p5, %s456_s5), 3  ;;  %p463_p12 = scmp.lt.s32.totalorder %s462_s2, 3 }
  0xca   : > { %1027 = vmatprep.subr.bf16.mxu1 %v1453_v0  ;;  %s459_s4 = scalar_lea.vmem %s1974_s3, %s2082_s5 }
  0xcb   : > { %975 = vmatmul.mubr.msk.f32.vlgmr.msra.gmra.mrb[0].mxu0 %vm485_vm1, %v473_v16  ;;  %v929_v30 = vld [vmem:[%s459_s4] ss:$0 sm:$0xff]  ;;  %s2084_s2 = smov (!%p463_p12, %s462_s2), 3  ;;  %s448_s17 = sand.u32 1, %s2046_s7  }
  0xcc   : > { %1012 = vmatprep.mubr.msk.f32.mxu0 %vm1454_vm0, %v1455_v1  ;;  %1035 = vmatpush3.bf16.msra.mxu0 %v1034_v24  ;;  %s465_s11 = scalar_lea.vmem %s2045_s20, %s2084_s2  ;;  %p469_p1 = scmp.lt.s32.totalorder %s468_s10, 3 }
  0xcd   : > { %1029 = vmatpush3.bf16.msra.mxu1 %v1028_v17  ;;  %1036 = vmatprep.subr.bf16.mxu0 %v1453_v0  ;;  %v931_v38 = vld [vmem:[%s465_s11] ss:$0 sm:$0xff]  ;;  %s927_s28 = sshll.u32 %s448_s17, 3  ;;  %s2049_s4 = sld [smem:[#allocation36_spill]] }
  0xce   : > { %1030 = vmatprep.subr.bf16.mxu1 %v1453_v0  ;;  %s2086_s10 = smov (!%p469_p1, %s468_s10), 3  ;;  %s450_s27 = scalar_lea.vmem [#allocation10], %s927_s28 }
  0xcf   : > { %s471_s9 = scalar_lea.vmem %s2047_s23, %s2086_s10  ;;  %s759_s5 = sshll.u32 %s450_s27, 4  ;;  %s1902_s5 = int_to_ptr.vmem [resolvable:$true] %s759_s5 }
  0xd0   : > { %1038 = vmatpush3.bf16.msra.mxu0 %v1037_v26  ;;  %v933_v43 = vld [vmem:[%s471_s9] ss:$0 sm:$0xff]  ;;  %s746_s15 = scalar_lea.sflag [#allocation6], %s448_s17  ;;  %s1297_s0 = scalar_lea.vmem %s1902_s5, 128 }
  0xd1   : > { %1032 = vmatpush3.bf16.msra.mxu1 %v1031_v20  ;;  %1039 = vmatprep.subr.bf16.mxu0 %v1453_v0  ;;  %p1298_p3 = scmp.ne.s32.totalorder %s1902_s5, %s1297_s0  ;;  %p2050_p10 = scmp.ne.s32.totalorder %s2048_s29, 0 }
  0xd2   : > { %s1301_s20 = sshll.u32 %s1456_s22, 4  ;;  %s1302_s20 = int_to_ptr.vmem [resolvable:$false] %s1301_s20 }
  0xd3   : > { %s1900_s2 = scalar_lea.hbm %s2049_s4, %s937_s26  ;;  %p1299_p0 = pnand %p1298_p3, %p2050_p10 }
  0xd4   : > { %1041 = vmatpush3.bf16.msra.mxu0 %v1040_v29  ;;  %s1303_s11 = scalar_lea.vmem %s1302_s20, 256  ;;  %p1304_p13 = scmp.lt.s32.totalorder %s1902_s5, %s1302_s20 }
  0xd5   : > { %1042 = vmatprep.subr.bf16.mxu0 %v1453_v0  ;;  %p1300_p6 = pneg %p1299_p0  ;;  %p1305_p11 = scmp.lt.s32.totalorder %s1303_s11, %s1297_s0 }
  0xd7   : > { %p1306_p9 = por %p1305_p11, %p1304_p13 }
  0xd8   : > { %1044 = vmatpush3.bf16.msra.mxu0 %v1043_v37 }
  0xd9   : > { %p1307_p2 = pnand %p1306_p9, %p1300_p6 }
 0x19e   : > { %v555_v31 = vpop.f32.mrb[0].mxu0 }
 0x19f   : > { %v556_v32 = vadd.f32 %v929_v30, %v555_v31  ;;  %v976_v33 = vpop.f32.mrb[1].mxu0 }
 0x1a1   : > { %v559_v34 = vmax.f32 %v556_v32, 0.0 }
 0x1a3   : > { %994 = vmatmul.mubr.msk.f32.vlgmr.msra.gmra.mrb[0].mxu1 %vm575_vm2, %v559_v34 }
 0x276   : > { %v645_v39 = vpop.f32.mrb[0].mxu1 }
 0x277   : > { %v646_v40 = vadd.f32 %v931_v38, %v645_v39  ;;  %v995_v41 = vpop.f32.mrb[1].mxu1 }
 0x279   : > { %v649_v42 = vmax.f32 %v646_v40, 0.0 }
 0x27b   : > { %1013 = vmatmul.mubr.msk.f32.vlgmr.msra.gmra.mrb[2].mxu0 %vm575_vm2, %v649_v42 }
 0x34e   : > { %v734_v44 = vpop.f32.mrb[2].mxu0 }
 0x34f   : > { %v735_v45 = vadd.f32 %v933_v43, %v734_v44  ;;  %v1014_v46 = vpop.f32.mrb[3].mxu0 }
 0x351   : > { %v935_v47 = vmul.f32 -1.442695, %v735_v45 }
 0x353   : > { %1191 = vpow2.f32 %v935_v47 }
 0x35d   : > { %v1192_v48 = vpop.eup %1191 }
 0x35e   : > { %v741_v49 = vadd.f32 1.0, %v1192_v48 }
 0x360   : > { %1193 = vrcp.f32 %v741_v49 }
 0x36a   : > { %v1194_v50 = vpop.eup %1193 }
 0x36b   : > { %744 = vst [vmem:[%s450_s27] sm:$0xff] %v1194_v50 }
 0x36c   : > { %1310 = shalt.err (!%p1307_p2)
}
 0x36d   : > { %s1311_s7 = scalar_lea.hbm %s1900_s2, 128  ;;  %s1315_s30 = scalar_lea.hbm %s2049_s4, 640 }
 0x36e   : > { %p1312_p4 = scmp.ne.s32.totalorder %s1900_s2, %s1311_s7  ;;  %p1316_p5 = scmp.lt.u32.totalorder %s1900_s2, %s2049_s4 }
 0x36f   : > { %p1317_p12 = scmp.lt.u32.totalorder %s1315_s30, %s1311_s7  ;;  %p1319_p3 = scmp.lt.u32.totalorder %s1311_s7, %s1900_s2 }
 0x370   : > { %p1313_p7 = pnand %p1312_p4, %p2050_p10 }
 0x371   : > { %p1318_p1 = por %p1317_p12, %p1316_p5 }
 0x372   : > { %p1314_p8 = pneg %p1313_p7 }
 0x373   : > { %p1320_p0 = por %p1319_p3, %p1318_p1 }
 0x375   : > { %p1321_p6 = pnand %p1320_p0, %p1314_p8 }
 0x377   : > { %1324 = shalt.err (!%p1321_p6)
}
 0x378   : > { %1057 = dma.vmem_to_hbm [thread:$0]  (%p2050_p10), %s1902_s5, 128, %s1900_s2, %s746_s15  }
 0x379 PF: > { %s2051_s17 = sld [smem:[#allocation22_spill]]  ;;  %s2052_s28 = sld [smem:[#allocation30_spill]] }
 0x37a   : > { %p1080_p13 = scmp.ge.s32.totalorder %s1445_s21, 2 }
 0x37f   : > { %s771_s26 = sand.u32 1, %s2051_s17   ;;  %p2053_p11 = scmp.ne.s32.totalorder %s2052_s28, 0 }
 0x380   : > { %s772_s27 = scalar_lea.sflag [#allocation6], %s771_s26 }
 0x381   : > { %p1076_p9 = pnand %p1080_p13, %p2053_p11 }
 0x383   : > { %1392 = dma.done.wait (!%p1076_p9), %s772_s27, 128  }
 0x384   : > { %1394 = vsyncadd (!%p1076_p9), %s772_s27, 4294967168  ;;  %s2054_s0 = sld [smem:[#allocation23_spill]]  ;;  %s2055_s10 = sld [smem:[#allocation24_spill]] }
 0x385   : > { %s2056_s11 = sld [smem:[#allocation28_spill]]  ;;  %s2057_s29 = sld [smem:[#allocation25_spill]] }
 0x386   : > { %s2058_s17 = sld [smem:[#allocation29_spill]]  ;;  %s2059_s5 = sld [smem:[#allocation26_spill]] }
 0x387   : > { %s2060_s20 = sld [smem:[#allocation31_spill]]  ;;  %p30_p10 = scmp.ge.s32.totalorder %s1573_s24, 7  }
 0x388   : > { %s2061_s12 = smov %s1413_s13  ;;  %s2062_s13 = smov %s1417_s14 }
 0x389   : > { %s2063_s14 = smov %s1782_s18  ;;  %s2064_s15 = smov %s1425_s16 }
 0x38a   : > { %s2066_s18 = smov %s1437_s19  ;;  %s2068_s21 = smov %s1573_s24 }
 0x38b   : > { %s2065_s16 = smov %s2057_s29  ;;  %32 = sbr.rel (!%p30_p10) target bundleno = 29 (0x1d), region = 129 }
 0x38c   : > { %s2067_s19 = smov %s2059_s5 }
 0x392   :  { %777 = vsyncpa [#allocation5], 1 }
 0x393   :  { %779 = vsyncpa [#allocation5 + $0x1], 1 }
 0x394   :  { %780 = vsyncpa [#allocation8], 1 }
 0x395   :  { %782 = vsyncpa [#allocation8 + $0x1], 1 }
 0x396   :  { %783 = vsyncpa [#allocation6], 1 }
 0x397   :  { %785 = vsyncpa [#allocation6 + $0x1], 1 }

</bundles_post_ra>
